<compile_context>
chip_gen: v7x
topology: tpu7x:2x2x1
jax: 0.10.0
libtpu: 0.0.40
codegen_flags: <defaults>
</compile_context>

<pallas_src>
import jax
import jax.numpy as jnp
from jax import lax
from jax.experimental import pallas as pl
from jax.experimental.pallas import tpu as pltpu


def _pick_tile(size: int, limit: int) -> int:
    """Largest divisor of `size` that is <= limit, preferring multiples of 8."""
    fallback = 1
    for cand in range(min(limit, size), 0, -1):
        if size % cand == 0:
            if cand % 8 == 0:
                return cand
            if fallback == 1:
                fallback = cand
    return fallback


def _make_ntxent_kernel(temperature: float, n: int, tm: int, tn: int,
                        num_col: int, unroll: int):
    inv_t = 1.0 / float(temperature)
    two_n = 2 * n

    def kernel(r_ref, o_ref):
        i = pl.program_id(0)                       # row-tile index ("parallel")
        row_start = pl.multiple_of(i * tm, tm)

        # ---- j-invariant work: hoisted, runs once per row tile -------------
        # Fold the temperature into the small LHS operand: O(tm*D), not O(tm*tn).
        r_row = r_ref[pl.ds(row_start, tm), :]                     # (tm, D)
        q = r_row * inv_t                                          # native dtype

        # ---- in-kernel column loop: flash-style online logsumexp -----------
        def col_step(k, carry):
            m_prev, l_prev = carry
            col_start = pl.multiple_of(k * tn, tn)
            r_col = r_ref[pl.ds(col_start, tn), :]                 # (tn, D)

            # sim[a, b] = <r_{row_start+a}, r_{col_start+b}> / T  (f32 accumulate)
            sim = lax.dot_general(
                q, r_col,
                dimension_numbers=(((1,), (1,)), ((), ())),
                preferred_element_type=jnp.float32,
            )                                                      # (tm, tn) f32

            # Mask diagonal entries that fall inside this tile (tile-local iotas).
            rg = row_start + lax.broadcasted_iota(jnp.int32, (tm, tn), 0)
            cg = col_start + lax.broadcasted_iota(jnp.int32, (tm, tn), 1)
            sim = jnp.where(rg == cg, jnp.float32(-1e30), sim)

            m_new = jnp.maximum(m_prev, jnp.max(sim, axis=-1, keepdims=True))
            l_new = (l_prev * jnp.exp(m_prev - m_new)
                     + jnp.sum(jnp.exp(sim - m_new), axis=-1, keepdims=True))
            return m_new, l_new

        m0 = jnp.full((tm, 1), -jnp.inf, dtype=jnp.float32)
        l0 = jnp.zeros((tm, 1), dtype=jnp.float32)
        m_fin, l_fin = lax.fori_loop(0, num_col, col_step, (m0, l0),
                                     unroll=unroll)

        # ---- positive-pair logit: row r's partner is (r + N) mod 2N --------
        # tm divides N, so the partners of one row tile form a single
        # contiguous, tile-aligned slice (no wrap inside the tile).
        pos_start = pl.multiple_of((i * tm + n) % two_n, tm)
        r_part = r_ref[pl.ds(pos_start, tm), :].astype(jnp.float32)
        pos = jnp.sum(r_row.astype(jnp.float32) * r_part,
                      axis=-1, keepdims=True) * inv_t              # (tm, 1)

        o_ref[...] = (m_fin + jnp.log(l_fin)) - pos                # (tm, 1)

    return kernel


def ntxent_loss(zis: jax.Array, zjs: jax.Array, temperature: float = 0.5, *,
                matmul_dtype=None) -> jax.Array:
    """Pallas implementation of NTXentLoss.forward (returns the loss_ce scalar)."""
    assert zis.ndim == 2 and zis.shape == zjs.shape
    n, d = zis.shape
    assert n % 8 == 0, "Pallas NTXent kernel expects batch size N to be a multiple of 8"

    reps = jnp.concatenate([zis, zjs], axis=0)             # (2N, D)
    two_n = 2 * n

    # Zero-pad D to a lane-aligned multiple of 128 (a no-op for every dot
    # product) so the MXU contraction dimension is dense.
    d_pad = ((d + 127) // 128) * 128
    if d_pad != d:
        reps = jnp.pad(reps, ((0, 0), (0, d_pad - d)))

    # Optional bf16 path for large problems (halves R footprint, fast MXU rate).
    # Default keeps the input dtype so the 1e-5 reference check holds exactly.
    if matmul_dtype is not None:
        reps = reps.astype(matmul_dtype)

    tm = _pick_tile(n, 256)        # row tile (divides N -> positive pairs tile-aligned)
    tn = _pick_tile(two_n, 512)    # column sub-tile for the in-kernel logsumexp loop
    num_row, num_col = two_n // tm, two_n // tn

    # Unroll factor for the in-kernel column loop: full unroll when short,
    # otherwise the largest small power-of-two divisor (keeps MXU/EUP overlap
    # without blowing up code size).
    if num_col <= 8:
        unroll = num_col
    elif num_col % 8 == 0:
        unroll = 8
    elif num_col % 4 == 0:
        unroll = 4
    elif num_col % 2 == 0:
        unroll = 2
    else:
        unroll = 1

    # Explicit VMEM budget: resident R (double-buffered by default even with a
    # constant block index) + sim/exp intermediates + margin.
    r_bytes = two_n * d_pad * reps.dtype.itemsize
    vmem_limit = int(min(128 * 1024 * 1024,
                         max(32 * 1024 * 1024,
                             2 * r_bytes + 8 * tm * tn * 4 + (8 << 20))))

    per_row = pl.pallas_call(
        _make_ntxent_kernel(temperature, n, tm, tn, num_col, unroll),
        out_shape=jax.ShapeDtypeStruct((two_n, 1), jnp.float32),
        grid_spec=pltpu.PrefetchScalarGridSpec(
            num_scalar_prefetch=0,
            grid=(num_row,),
            # R is VMEM-resident for the whole kernel: constant block index ->
            # a single DMA; row / column / partner tiles are sliced in-kernel.
            in_specs=[pl.BlockSpec((two_n, d_pad), lambda i: (0, 0))],
            out_specs=pl.BlockSpec((tm, 1), lambda i: (i, 0)),
        ),
        compiler_params=pltpu.CompilerParams(
            dimension_semantics=("parallel",),     # row tiles shard across TCs
            vmem_limit_bytes=vmem_limit,
        ),
    )(reps)

    return jnp.sum(per_row) / jnp.float32(two_n)


def _ntxent_loss_ref(zis, zjs, temperature=0.5):
    """Pure-JAX reference matching the PyTorch module's returned loss_ce."""
    reps = jnp.concatenate([zis, zjs], axis=0).astype(jnp.float32)
    two_n = reps.shape[0]
    n = two_n // 2
    sim = (reps @ reps.T) / temperature
    logits = jnp.where(jnp.eye(two_n, dtype=bool), -jnp.inf, sim)
    labels = jnp.concatenate([jnp.arange(n) + n, jnp.arange(n)])
    lse = jax.scipy.special.logsumexp(logits, axis=1)
    pos = sim[jnp.arange(two_n), labels]
    return jnp.sum(lse - pos) / two_n


if __name__ == "__main__":
    key = jax.random.PRNGKey(0)
    k1, k2 = jax.random.split(key)
    N, D = 8, 32
    zis = jax.random.normal(k1, (N, D), dtype=jnp.float32)
    zjs = jax.random.normal(k2, (N, D), dtype=jnp.float32)

    loss = ntxent_loss(zis, zjs, temperature=0.5)
    jax.block_until_ready(loss)

    ref = _ntxent_loss_ref(zis, zjs, temperature=0.5)
    assert jnp.allclose(loss, ref, rtol=1e-5, atol=1e-5), (loss, ref)
    print("KERNEL_OK")
</pallas_src>

<mosaic_0001>
module attributes {stable_mosaic.version = 11 : i64} {
  func.func @kernel(%arg0: i32, %arg1: memref<16x128xf32, #tpu.memory_space<vmem>>, %arg2: memref<8x1xf32, #tpu.memory_space<vmem>>) attributes {dimension_semantics = [#tpu.dimension_semantics<parallel>], iteration_bounds = array<i64: 2>, scalar_prefetch = 0 : i64, scratch_operands = 0 : i64, tpu.core_type = #tpu.core_type<tc>, window_params = [{pipeline_mode = #tpu.pipeline_mode<synchronous>, transform_indices = @transform_0, window_bounds = array<i64: 16, 128>}, {transform_indices = @transform_1, window_bounds = array<i64: 8, 1>}]} {
    %c8_i32 = arith.constant 8 : i32
    %0 = arith.muli %arg0, %c8_i32 : i32
    %1 = tpu.assume_multiple %0, 8 : i32
    %2 = arith.index_cast %1 : i32 to index
    %c0 = arith.constant 0 : index
    %3 = vector.load %arg1[%2, %c0] : memref<16x128xf32, #tpu.memory_space<vmem>>, vector<8x128xf32>
    %cst = arith.constant 2.000000e+00 : f32
    %4 = vector.broadcast %cst : f32 to vector<8x128xf32>
    %5 = arith.mulf %3, %4 : vector<8x128xf32>
    %cst_0 = arith.constant 0xFF800000 : f32
    %6 = vector.broadcast %cst_0 : f32 to vector<8x1xf32>
    %cst_1 = arith.constant 0.000000e+00 : f32
    %7 = vector.broadcast %cst_1 : f32 to vector<8x1xf32>
    %c0_i32 = arith.constant 0 : i32
    %c16_i32 = arith.constant 16 : i32
    %8 = arith.muli %c0_i32, %c16_i32 : i32
    %9 = tpu.assume_multiple %8, 16 : i32
    %10 = arith.index_cast %9 : i32 to index
    %c0_2 = arith.constant 0 : index
    %11 = vector.load %arg1[%10, %c0_2] : memref<16x128xf32, #tpu.memory_space<vmem>>, vector<16x128xf32>
    %cst_3 = arith.constant dense<0.000000e+00> : vector<8x16xf32>
    %12 = tpu.matmul %5, %11, %cst_3 {dimension_numbers = #tpu.dot_dimension_numbers<[1], [1], [0], [0], [0, 0, 1, 0], [], []>} : vector<8x128xf32>, vector<16x128xf32>, vector<8x16xf32> -> vector<8x16xf32>
    %13 = tpu.iota {dimensions = array<i32: 0>} : vector<8x16xi32>
    %14 = vector.broadcast %1 : i32 to vector<8x16xi32>
    %15 = arith.addi %14, %13 : vector<8x16xi32>
    %16 = tpu.iota {dimensions = array<i32: 1>} : vector<8x16xi32>
    %17 = vector.broadcast %9 : i32 to vector<8x16xi32>
    %18 = arith.addi %17, %16 : vector<8x16xi32>
    %19 = arith.cmpi eq, %15, %18 : vector<8x16xi32>
    %cst_4 = arith.constant -1.000000e+30 : f32
    %20 = vector.broadcast %cst_4 : f32 to vector<8x16xf32>
    %21 = arith.select %19, %20, %12 : vector<8x16xi1>, vector<8x16xf32>
    %cst_5 = arith.constant dense<0xFF800000> : vector<8xf32>
    %22 = vector.multi_reduction <maximumf>, %21, %cst_5 [1] : vector<8x16xf32> to vector<8xf32>
    %23 = vector.shape_cast %22 : vector<8xf32> to vector<8x1xf32>
    %24 = arith.maximumf %6, %23 : vector<8x1xf32>
    %25 = arith.subf %6, %24 : vector<8x1xf32>
    %26 = math.exp %25 : vector<8x1xf32>
    %27 = arith.mulf %7, %26 : vector<8x1xf32>
    %28 = vector.broadcast %24 : vector<8x1xf32> to vector<8x16xf32>
    %29 = arith.subf %21, %28 : vector<8x16xf32>
    %30 = math.exp %29 : vector<8x16xf32>
    %cst_6 = arith.constant dense<0.000000e+00> : vector<8xf32>
    %31 = vector.multi_reduction <add>, %30, %cst_6 [1] : vector<8x16xf32> to vector<8xf32>
    %32 = vector.shape_cast %31 : vector<8xf32> to vector<8x1xf32>
    %33 = arith.addf %27, %32 : vector<8x1xf32>
    %c1_i32 = arith.constant 1 : i32
    %c8_i32_7 = arith.constant 8 : i32
    %34 = arith.muli %arg0, %c8_i32_7 : i32
    %c8_i32_8 = arith.constant 8 : i32
    %35 = arith.addi %34, %c8_i32_8 : i32
    %c16_i32_9 = arith.constant 16 : i32
    %c0_i32_10 = arith.constant 0 : i32
    %36 = arith.cmpi eq, %c16_i32_9, %c0_i32_10 : i32
    %c1_i32_11 = arith.constant 1 : i32
    %37 = arith.select %36, %c1_i32_11, %c16_i32_9 : i32
    %38 = arith.remsi %35, %37 : i32
    %c0_i32_12 = arith.constant 0 : i32
    %39 = arith.cmpi ne, %38, %c0_i32_12 : i32
    %c0_i32_13 = arith.constant 0 : i32
    %40 = arith.cmpi slt, %38, %c0_i32_13 : i32
    %c0_i32_14 = arith.constant 0 : i32
    %41 = arith.cmpi slt, %37, %c0_i32_14 : i32
    %42 = arith.xori %40, %41 : i1
    %43 = arith.andi %42, %39 : i1
    %44 = arith.addi %38, %37 : i32
    %45 = arith.select %43, %44, %38 : i32
    %46 = tpu.assume_multiple %45, 8 : i32
    %47 = arith.index_cast %46 : i32 to index
    %c0_15 = arith.constant 0 : index
    %48 = vector.load %arg1[%47, %c0_15] : memref<16x128xf32, #tpu.memory_space<vmem>>, vector<8x128xf32>
    %49 = arith.mulf %3, %48 : vector<8x128xf32>
    %cst_16 = arith.constant dense<0.000000e+00> : vector<8xf32>
    %50 = vector.multi_reduction <add>, %49, %cst_16 [1] : vector<8x128xf32> to vector<8xf32>
    %51 = vector.shape_cast %50 : vector<8xf32> to vector<8x1xf32>
    %cst_17 = arith.constant 2.000000e+00 : f32
    %52 = vector.broadcast %cst_17 : f32 to vector<8x1xf32>
    %53 = arith.mulf %51, %52 : vector<8x1xf32>
    %54 = math.log %33 : vector<8x1xf32>
    %55 = arith.addf %24, %54 : vector<8x1xf32>
    %56 = arith.subf %55, %53 : vector<8x1xf32>
    %c0_18 = arith.constant 0 : index
    %c0_19 = arith.constant 0 : index
    %57 = vector.load %arg2[%c0_18, %c0_19] : memref<8x1xf32, #tpu.memory_space<vmem>>, vector<8x1xf32>
    tpu.vector_store %arg2[%c0_18, %c0_19], %56 {strides = array<i32>} : memref<8x1xf32, #tpu.memory_space<vmem>>, vector<8x1xf32>,
    return
  }
  func.func @transform_0(%arg0: i32) -> (i32, i32) {
    %c0_i32 = arith.constant 0 : i32
    %c0_i32_0 = arith.constant 0 : i32
    %c0_i32_1 = arith.constant 0 : i32
    return %c0_i32, %c0_i32_0 : i32, i32
  }
  func.func @transform_1(%arg0: i32) -> (i32, i32) {
    %c0_i32 = arith.constant 0 : i32
    %c0_i32_0 = arith.constant 0 : i32
    return %arg0, %c0_i32 : i32, i32
  }
}

</mosaic_0001>

<bundles_post_ra>
// kernel: tpu_custom_call.1
= control target key start
LH: loop header
LB: loop body
LE: loop exit
PB: predicated region body
PF: predicated region fallthrough
CT: control target
= control target key end

     0   :  { %6 = vsyncpa [#allocation3], 0  ;;  %s404_s6 = smov 0   ;;  %s460_s0 = inlined_call_operand.hbm [shape: f32[16,128], index: 0, kind: input, shape index: {}]   ;;  %s461_s1 = inlined_call_operand.vmem [shape: f32[16,1], index: 1, kind: output, shape index: {}]  }
   0x1 LB: > { %s410_s7 = sadd.s32 4294967295, %s386_s6   ;;  %p294_p0 = scmp.ge.s32.totalorder %s386_s6, 1  ;;  %s386_s6 = sphi %s404_s6, %s12_s6  }
   0x2   : > { %p64_p1 = scmp.lt.s32.totalorder %s386_s6, 3  ;;  %s388_s8 = smov [#allocation2]  }
   0x3   : > { %s76_s9 = sshll.u32 %s388_s8, 4  ;;  %p462_p3 = scmp.eq.s32.totalorder %s410_s7, 0  ;;  %s77_s9 = int_to_ptr.vmem [resolvable:$true] %s76_s9 }
   0x4   : > { %p414_p2 = pnand %p294_p0, %p64_p1  ;;  %s348_s14 = scalar_lea.hbm %s460_s0, 256 }
   0x5   : > { %p349_p6 = scmp.ne.s32.totalorder %s460_s0, %s348_s14  ;;  %p355_p10 = scmp.lt.u32.totalorder %s348_s14, %s460_s0 }
   0x6   : > { %s464_s10 = scalar_select %p414_p2, 1, 0 }
   0x7   : > { %p322_p4 = pneg %p414_p2 }
   0x9   : > { %p423_p5 = pnand %p462_p3, %p322_p4 }
   0xb   : > { %p350_p7 = pneg %p423_p5 }
   0xd   : > { %p351_p8 = pnand %p350_p7, %p349_p6 }
   0xf   : > { %p352_p9 = pneg %p351_p8 }
  0x11   : > { %p357_p11 = pnand %p355_p10, %p352_p9 }
  0x13   : > { %360 = shalt.err (!%p357_p11)
}
  0x14   : > { %s361_s19 = scalar_lea.vmem %s77_s9, 256  ;;  %p369_p1 = scmp.lt.s32.totalorder %s77_s9, %s77_s9 }
  0x15   : > { %p362_p12 = scmp.ne.s32.totalorder %s77_s9, %s361_s19  ;;  %p370_p4 = scmp.lt.s32.totalorder %s361_s19, %s361_s19 }
  0x17   : > { %p364_p13 = pnand %p362_p12, %p350_p7  ;;  %p371_p3 = por %p370_p4, %p369_p1 }
  0x19   : > { %p365_p0 = pneg %p364_p13 }
  0x1b   : > { %p372_p2 = pnand %p371_p3, %p365_p0 }
  0x1d   : > { %375 = shalt.err (!%p372_p2)
}
  0x1e   : > { %s389_s20 = smov 128   ;;  %s390_s21 = smov 8  }
  0x1f   : > { %325 = dma.hbm_to_vmem [thread:$0]  (!%p423_p5), %s460_s0, 256, %s77_s9, [#allocation3], %s389_s20, %s389_s20, %s390_s21  }
  0x20   : > { %p466_p6 = scmp.ne.s32.totalorder %s464_s10, 0 }
  0x21   : > { %p467_p8 = scmp.eq.s32.totalorder (!%p466_p6), %s410_s7, 0 }
  0x22   : > { %92 = sbr.rel (%p466_p6) target bundleno = 586 (0x24a), region = 24 }
  0x29   : > { %381 = dma.done.wait (%p467_p8), [#allocation3], 256   ;;  %p468_p7 = pmov %p467_p8 }
  0x2a   : > { %v391_v0 = vmov 0.0|0.0   ;;  %vm392_vm0 = vmmov 0   ;;  %v393_v1 = vmov 0.0   ;;  %s299_s24 = sshll.u32 %s410_s7, 3  ;;  %v114_v2 = vld [vmem:[#allocation2] sm:$0xff]  ;;  %v115_v3 = vld [vmem:[#allocation2 + $0x8] sm:$0xff]  ;;  %v186_v7 = vlaneseq }
  0x2b   : > { %383 = vsyncadd (%p468_p7), [#allocation3], 4294967040  ;;  %315 = vmatprep.subr.bf16.mxu0 %v391_v0  ;;  %312 = vmatprep.mubr.msk.f32.mxu0 %vm392_vm0, %v393_v1  ;;  %v316_v4 = vpack.c.bf16 %v115_v3, %v114_v2  ;;  %s111_s25 = scalar_lea.vmem [#allocation2], %s299_s24  ;;  %v188_v9 = vstv %s299_s24  ;;  %vm196_vm2 = vcmask 130048   ;;  %s211_s26 = sadd.s32 8, %s299_s24  ;;  %vm234_vm3 = vcmask 7168  }
  0x2c   : > { %v112_v5 = vld [vmem:[%s111_s25] sm:$0xff]  ;;  %v187_v8 = vshrl.u32 %v186_v7, 7  ;;  %v191_v11 = vand.u32 127, %v186_v7  ;;  %p212_p2 = scmp.lt.s32.totalorder %s211_s26, 0  ;;  %s213_s27 = ssub.s32 0, %s211_s26 }
  0x2d   : > { %317 = vmatpush3.bf16.xpose.msra.mxu0 %v316_v4  ;;  %v113_v6 = vmul.f32 2.0, %v112_v5  ;;  %s300_s28 = smin.u32 %s213_s27, %s211_s26  ;;  %p106_p5 = scmp.lt.s32.totalorder %s410_s7, 1 }
  0x2e   : > { %v189_v10 = vadd.s32 %v188_v9, %v187_v8  ;;  %s215_s29 = sand.u32 15, %s300_s28  }
  0x2f   : > { %s216_s30 = ssub.s32 0, %s215_s29  ;;  %s474_s7 = smov (!%p106_p5, %s410_s7), 1 }
  0x30   : > { %vm194_vm1 = vcmp.eq.s32.totalorder %v189_v10, %v191_v11  ;;  %s470_s30 = smov (!%p212_p2, %s216_s30), %s215_s29  ;;  %s298_s4 = sshll.u32 %s474_s7, 3 }
  0x31   : > { %p302_p3 = scmp.lt.s32.totalorder %s470_s30, 0  ;;  %s222_s2 = sadd.s32 16, %s470_s30 }
  0x32   : > { %s109_s9 = scalar_lea.vmem %s461_s1, %s298_s4 }
  0x33   : > { %s472_s2 = smov (!%p302_p3, %s222_s2), %s470_s30 }
  0x34   : > { %313 = vmatmul.mubr.f32.vlgmr.msra.gmra.mrb[0].mxu0 %v113_v6  ;;  %s224_s3 = scalar_lea.vmem [#allocation2], %s472_s2 }
  0x35   : > { %v225_v16 = vld [vmem:[%s224_s3] sm:$0xff] }
  0x36   : > { %v226_v17 = vmul.f32 %v225_v16, %v112_v5 }
  0x38   : > { %227 = vadd.xlane.f32.xlu1 %v226_v17 }
  0xc5   : > { %v228_v29 = vpop.xlane.xlu1 %227 }
  0xc6   : > { %v229_v32 = vmul.f32 2.0, %v228_v29 }
 0x107   : > { %v182_v12 = vpop.f32.mrb[0].mxu0 }
 0x108   : > { %v195_v13 = vsel %vm194_vm1, -1e+30, %v182_v12  ;;  %v314_v14 = vpop.f32.mrb[1].mxu0 }
 0x109   : > { %v197_v15 = vsel %vm196_vm2, %v195_v13, -inf }
 0x10a   : > { %198 = vmax.xlane.f32.xlu0 %v197_v15 }
 0x197   : > { %v199_v18 = vpop.xlane.xlu0 %198 }
 0x198   : > { %v204_v19 = vsub.f32 %v195_v13, %v199_v18  ;;  %v200_v23 = vsub.f32 -inf, %v199_v18 }
 0x19a   : > { %v205_v20 = vmul.f32 1.442695, %v204_v19  ;;  %v201_v24 = vmul.f32 1.442695, %v200_v23 }
 0x19c   : > { %342 = vpow2.f32 %v205_v20 }
 0x19d   : > { %344 = vpow2.f32 %v201_v24 }
 0x1a6   : > { %v343_v21 = vpop.eup %342 }
 0x1a7   : > { %v207_v22 = vsel %vm196_vm2, %v343_v21, 0.0  ;;  %v345_v25 = vpop.eup %344 }
 0x1a8   : > { %208 = vadd.xlane.f32.xlu0 %v207_v22  ;;  %v203_v26 = vmul.f32 0.0, %v345_v25 }
 0x235   : > { %v209_v27 = vpop.xlane.xlu0 %208 }
 0x236   : > { %v210_v28 = vadd.f32 %v209_v27, %v203_v26 }
 0x238   : > { %346 = vlog2.f32 %v210_v28 }
 0x242   : > { %v347_v30 = vpop.eup %346 }
 0x243   : > { %v231_v31 = vmul.f32 0.6931472, %v347_v30 }
 0x245   : > { %v232_v33 = vadd.f32 %v231_v31, %v199_v18 }
 0x247   : > { %v233_v34 = vsub.f32 %v232_v33, %v229_v32 }
 0x249   : > { %235 = vst.msk [vmem:[%s109_s9] sm:$0xff] %vm234_vm3, %v233_v34 }
 0x24a PF: > { %s12_s6 = sadd.s32 1, %s386_s6  }
 0x24b   : > { %p9_p9 = scmp.ge.s32.totalorder %s12_s6, 4  }
 0x24d   :  { %11 = sbr.rel (!%p9_p9) target bundleno = 1 (0x1), region = 58 }
 0x254   :  { %255 = vsyncpa [#allocation3], 1 }
 0x255   :  { %257 = vsyncpa [#allocation3 + $0x1], 1 }

</bundles_post_ra>
